<compile_context>
chip_gen: v7x
topology: tpu7x:2x2x1
jax: 0.10.0
libtpu: 0.0.40
codegen_flags: <defaults>
</compile_context>

<pallas_src>
import functools

import numpy as np
import jax
import jax.numpy as jnp
from jax import lax
from jax.experimental import pallas as pl
from jax.experimental.pallas import tpu as pltpu


_TARGET_BLOCK_BYTES = 4 * 1024 * 1024   # per input tile (x2 double-buffered) — safe on v5e's 16 MiB scoped default
_SMALL_INPUT_BYTES = 1 << 20            # below this, skip Pallas entirely


def _round_up(x, m):
    return ((x + m - 1) // m) * m


def _cdiv(a, b):
    return -(-a // b)


def _sublane(itemsize):
    # sublane multiple for packed dtypes: f32/i32 -> 8, bf16 -> 16, int8/fp8 -> 32
    return max(8, 32 // itemsize)


# ---------------------------------------------------------------------------
# Kernel A: reduction over the LAST (lane) axis of an (M, K) view.
#   grid = (n_m, n_k); k (reduction) axis last / "arbitrary".
#   acc_ref is a (TM, W) lane-wise partial accumulator (W = min(TK, 128)):
#   per-K-tile work is pure VALU adds; the single cross-lane reduce happens
#   once per M tile in the finalize and produces a lane-dense (1, TM) row.
# ---------------------------------------------------------------------------
def _sum_last_kernel(x_ref, o_ref, acc_ref, *, k_total, tk, chunks, is_float):
    k = pl.program_id(1)

    @pl.when(k == 0)
    def _init():
        acc_ref[...] = jnp.zeros_like(acc_ref)

    x = x_ref[...].astype(acc_ref.dtype)                       # (TM, TK)
    if k_total % tk != 0:
        # Mask the reduction-axis tail tile (edge blocks read undefined data).
        col = k * tk + lax.broadcasted_iota(jnp.int32, x.shape, 1)
        x = jnp.where(col < k_total, x, jnp.zeros_like(x))

    w = acc_ref.shape[1]
    part = x[:, :w]
    for j in range(1, chunks):                                 # static unroll: VALU adds
        part = part + x[:, j * w:(j + 1) * w]
    acc_ref[...] += part

    @pl.when(k == pl.num_programs(1) - 1)
    def _finalize():
        acc = acc_ref[...]
        if is_float:
            # ones(1,W) . acc^T -> (1, TM): per-row sums come out lane-dense on the
            # MXU (otherwise idle in this mem-bound kernel).  Once per M tile only.
            ones_row = jnp.ones((1, acc.shape[1]), acc.dtype)
            row = lax.dot_general(
                ones_row, acc,
                dimension_numbers=(((1,), (1,)), ((), ())),
                precision=lax.Precision.HIGHEST,
                preferred_element_type=acc.dtype)
        else:
            row = jnp.sum(acc, axis=-1)[None, :]               # exact integer path
        # fold the `a + a` into a single *2 on the reduced row
        o_ref[...] = ((row * 2).astype(o_ref.dtype))[None]     # (1, 1, TM)


# ---------------------------------------------------------------------------
# Kernel B: reduction over a MIDDLE axis of a (pre, K, post) view
# (sublane reduce) — no HBM transpose, output is lane-dense.
#   grid = (n_pre, n_post, n_k); k (reduction) axis last / "arbitrary".
#   Blocks batch TPRE `pre` rows to amortize per-grid-step overhead.
# ---------------------------------------------------------------------------
def _sum_mid_kernel(x_ref, o_ref, acc_ref, *, k_total, tk):
    k = pl.program_id(2)

    @pl.when(k == 0)
    def _init():
        acc_ref[...] = jnp.zeros_like(acc_ref)

    x = x_ref[...].astype(acc_ref.dtype)                       # (TPRE, TK, TP)
    if k_total % tk != 0:
        row = k * tk + lax.broadcasted_iota(jnp.int32, x.shape, 1)
        x = jnp.where(row < k_total, x, jnp.zeros_like(x))
    acc_ref[...] += jnp.sum(x, axis=1, keepdims=True)          # (TPRE, 1, TP)

    @pl.when(k == pl.num_programs(2) - 1)
    def _finalize():
        o_ref[...] = (acc_ref[...] * 2).astype(o_ref.dtype)


def keepdim_sum(a, axis, keepdim, dtype=None, *, force_pallas=False):
    """Pallas equivalent of: torch.sum(a + a, axis, keepdim=keepdim, dtype=dtype)."""
    out_dtype = jnp.dtype(dtype) if dtype is not None else jnp.dtype(a.dtype)
    is_float = jnp.issubdtype(out_dtype, jnp.floating)
    acc_dtype = jnp.float32 if is_float else jnp.int32
    # TODO(synk): torch promotes bool/int inputs to int64 when dtype=None and casts the
    # input to an integer `dtype=` before summing; here we accumulate in f32/i32 and
    # cast once on output (JAX default config has no int64).

    nd = a.ndim
    axis = axis % nd
    itemsize = jnp.dtype(a.dtype).itemsize
    out_itemsize = jnp.dtype(out_dtype).itemsize
    sub = _sublane(itemsize)

    # Small-input fast path: pallas_call fixed cost dominates tiny tensors.
    if not force_pallas and a.size * itemsize < _SMALL_INPUT_BYTES:
        res = jnp.sum(a.astype(acc_dtype), axis=axis, keepdims=keepdim) * 2
        return res.astype(out_dtype)

    if axis == nd - 1:
        # ---------------- Path A: lane reduction over (M, K) ----------------
        lead_shape = a.shape[:-1]
        K = a.shape[-1]
        M = int(np.prod(lead_shape)) if lead_shape else 1
        x2 = a.reshape(M, K)                         # contiguous flatten: no HBM copy

        if K < 128:
            TK, W = K, K                             # full-dim lane block (always legal)
        else:
            TK = min(2048, (K // 128) * 128)         # multiple of 128; tail masked in-kernel
            W = 128
        n_k = _cdiv(K, TK)
        chunks = TK // W

        tm_cap = max(sub, min(2048, (_TARGET_BLOCK_BYTES // (TK * itemsize)) // sub * sub))
        TM = M if M <= tm_cap else tm_cap
        n_m = _cdiv(M, TM)
        if n_m == 1 and M >= 2 * sub:
            # Guarantee >=2 blocks on the "parallel" axis (v7x has 2 TensorCores).
            TM = _round_up(_cdiv(M, 2), sub)
            n_m = _cdiv(M, TM)

        kern = functools.partial(_sum_last_kernel, k_total=K, tk=TK,
                                 chunks=chunks, is_float=is_float)
        out = pl.pallas_call(
            kern,
            out_shape=jax.ShapeDtypeStruct((n_m, 1, TM), out_dtype),
            grid=(n_m, n_k),
            in_specs=[pl.BlockSpec((TM, TK), lambda i, k: (i, k))],
            out_specs=pl.BlockSpec((1, 1, TM), lambda i, k: (i, 0, 0)),
            scratch_shapes=[pltpu.VMEM((TM, W), acc_dtype)],
            compiler_params=pltpu.CompilerParams(
                dimension_semantics=("parallel", "arbitrary")),
            cost_estimate=pl.CostEstimate(
                flops=2 * M * K, transcendentals=0,
                bytes_accessed=M * K * itemsize + M * out_itemsize),
        )(x2)

        # rows beyond M (tail of the last M block) are garbage -> sliced away
        res = out.reshape(-1)[:M].reshape(lead_shape)
    else:
        # --------- Path B: sublane reduction over (pre, K, post) ------------
        pre_shape = a.shape[:axis]
        post_shape = a.shape[axis + 1:]
        K = a.shape[axis]
        pre = int(np.prod(pre_shape)) if pre_shape else 1
        post = int(np.prod(post_shape)) if post_shape else 1
        x3 = a.reshape(pre, K, post)                 # contiguous flatten: no HBM copy

        if K <= 1024:
            TK = K                                   # full-dim sublane block (always legal)
        else:
            TK = 512                                 # tail masked in-kernel
        n_k = _cdiv(K, TK)

        if post < 128:
            TP = post                                # full-dim lane block
            # TODO(synk): post < 128 gives lane-sparse DMA rows; a lane-dense (K*post)
            # flatten would restore full HBM bandwidth for this case.
        else:
            tp_cap = max(128, (_TARGET_BLOCK_BYTES // (TK * itemsize)) // 128 * 128)
            TP = min(tp_cap, (post // 128) * 128)
        n_post = _cdiv(post, TP)

        TPRE = max(1, min(pre,
                          _TARGET_BLOCK_BYTES // (TK * TP * itemsize),
                          (1 << 20) // (TP * 4)))    # keep acc/out blocks ~<=1 MiB
        n_pre = _cdiv(pre, TPRE)
        if n_pre * n_post == 1 and pre >= 2:
            # Guarantee >=2 parallel blocks for the 2nd TensorCore on v7x.
            TPRE = _cdiv(pre, 2)
            n_pre = _cdiv(pre, TPRE)

        kern = functools.partial(_sum_mid_kernel, k_total=K, tk=TK)
        out = pl.pallas_call(
            kern,
            out_shape=jax.ShapeDtypeStruct((n_pre * TPRE, 1, n_post * TP), out_dtype),
            grid=(n_pre, n_post, n_k),
            in_specs=[pl.BlockSpec((TPRE, TK, TP), lambda p, j, k: (p, k, j))],
            out_specs=pl.BlockSpec((TPRE, 1, TP), lambda p, j, k: (p, 0, j)),
            scratch_shapes=[pltpu.VMEM((TPRE, 1, TP), acc_dtype)],
            compiler_params=pltpu.CompilerParams(
                dimension_semantics=("parallel", "parallel", "arbitrary")),
            cost_estimate=pl.CostEstimate(
                flops=2 * pre * K * post, transcendentals=0,
                bytes_accessed=pre * K * post * itemsize + pre * post * out_itemsize),
        )(x3)

        # rows beyond `pre` / columns beyond `post` are garbage -> sliced away
        res = out[:pre, 0, :post].reshape(pre_shape + post_shape)

    if keepdim:
        res = jnp.expand_dims(res, axis)
    return res


if __name__ == "__main__":
    key = jax.random.PRNGKey(0)
    k1, k2, k3, k4, k5, k6, k7 = jax.random.split(key, 7)

    failures = []

    def check(name, x, axis, keepdim, dtype=None, force=True):
        got = keepdim_sum(x, axis, keepdim, dtype, force_pallas=force)
        jax.block_until_ready(got)
        ref = jnp.sum(x + x, axis=axis, keepdims=keepdim, dtype=dtype)
        good = (got.shape == ref.shape and got.dtype == ref.dtype and
                np.allclose(np.asarray(got), np.asarray(ref), rtol=1e-5, atol=1e-3))
        if not good:
            failures.append(name)

    # Small NCHW-like input consistent with the test module (forced through Pallas).
    x = jax.random.normal(k1, (2, 4, 16, 16), dtype=jnp.float32)
    check("nchw_axis1_keep", x, 1, True)      # channels   (sublane-reduce path)
    check("nchw_axis3",      x, 3, False)     # last dim   (lane-reduce path)
    check("nchw_axis0_keep", x, 0, True)      # batch      (sublane-reduce path)
    check("nchw_axis2",      x, 2, False)     # height     (sublane-reduce path)
    check("nchw_fastpath",   x, 1, True, force=False)   # small-input XLA fast path

    # Larger / non-divisible shapes exercising multi-tile grids and tail masking.
    xa = jax.random.normal(k2, (96, 3000), dtype=jnp.float32)          # Path A, K-tail mask
    check("lane_Ktail", xa, -1, False)
    xb = jax.random.normal(k3, (4, 300, 513), dtype=jnp.float32)       # Path B, post tail
    check("mid_posttail", xb, 1, True)
    xd = jax.random.normal(k4, (2, 1500, 256), dtype=jnp.float32)      # Path B, K-tail mask
    check("mid_Ktail", xd, 1, False)

    # dtype= argument (bf16 input, f32 accumulation/output).
    xc = jax.random.normal(k5, (64, 2000), dtype=jnp.bfloat16)
    check("bf16_to_f32", xc, 1, True, dtype=jnp.float32)

    # Integer paths (exact).
    xi = jax.random.randint(k6, (8, 64, 100), -8, 8, dtype=jnp.int32)
    check("int_lane", xi, 2, False)
    xi2 = jax.random.randint(k7, (4, 50, 256), -8, 8, dtype=jnp.int32)
    check("int_mid", xi2, 1, True)

    if not failures:
        print("KERNEL_OK")
    else:
        print("FAILED: " + ", ".join(failures))
</pallas_src>

<mosaic_0001>
module attributes {stable_mosaic.version = 11 : i64} {
  func.func @_sum_mid_kernel(%arg0: i32, %arg1: i32, %arg2: i32, %arg3: memref<1x4x256xf32, #tpu.memory_space<vmem>>, %arg4: memref<1x1x256xf32, #tpu.memory_space<vmem>>, %arg5: memref<1x1x256xf32, #tpu.memory_space<vmem>>) attributes {dimension_semantics = [#tpu.dimension_semantics<parallel>, #tpu.dimension_semantics<parallel>, #tpu.dimension_semantics<arbitrary>], iteration_bounds = array<i64: 2, 1, 1>, scalar_prefetch = 0 : i64, scratch_operands = 1 : i64, tpu.core_type = #tpu.core_type<tc>, window_params = [{transform_indices = @transform_0, window_bounds = array<i64: 1, 4, 256>}, {transform_indices = @transform_1, window_bounds = array<i64: 1, 1, 256>}]} {
    %c0_i32 = arith.constant 0 : i32
    %0 = arith.cmpi eq, %arg2, %c0_i32 : i32
    %1 = arith.extui %0 : i1 to i32
    %c0_i32_0 = arith.constant 0 : i32
    %2 = arith.cmpi ne, %1, %c0_i32_0 : i32
    scf.if %2 {
      %cst_11 = arith.constant 0.000000e+00 : f32
      %12 = vector.broadcast %cst_11 : f32 to vector<1x1x256xf32>
      %c0_12 = arith.constant 0 : index
      %c0_13 = arith.constant 0 : index
      %c0_14 = arith.constant 0 : index
      %13 = vector.load %arg5[%c0_12, %c0_13, %c0_14] : memref<1x1x256xf32, #tpu.memory_space<vmem>>, vector<1x1x256xf32>
      tpu.vector_store %arg5[%c0_12, %c0_13, %c0_14], %12 {strides = array<i32>} : memref<1x1x256xf32, #tpu.memory_space<vmem>>, vector<1x1x256xf32>,
    } else {
    }
    %c0 = arith.constant 0 : index
    %c0_1 = arith.constant 0 : index
    %c0_2 = arith.constant 0 : index
    %3 = vector.load %arg3[%c0, %c0_1, %c0_2] : memref<1x4x256xf32, #tpu.memory_space<vmem>>, vector<1x4x256xf32>
    %c0_3 = arith.constant 0 : index
    %c0_4 = arith.constant 0 : index
    %c0_5 = arith.constant 0 : index
    %4 = vector.load %arg5[%c0_3, %c0_4, %c0_5] : memref<1x1x256xf32, #tpu.memory_space<vmem>>, vector<1x1x256xf32>
    %cst = arith.constant dense<0.000000e+00> : vector<1x256xf32>
    %5 = vector.multi_reduction <add>, %3, %cst [1] : vector<1x4x256xf32> to vector<1x256xf32>
    %6 = vector.shape_cast %5 : vector<1x256xf32> to vector<1x1x256xf32>
    %7 = arith.addf %4, %6 : vector<1x1x256xf32>
    %c0_6 = arith.constant 0 : index
    %c0_7 = arith.constant 0 : index
    %c0_8 = arith.constant 0 : index
    %8 = vector.load %arg5[%c0_6, %c0_7, %c0_8] : memref<1x1x256xf32, #tpu.memory_space<vmem>>, vector<1x1x256xf32>
    tpu.vector_store %arg5[%c0_6, %c0_7, %c0_8], %7 {strides = array<i32>} : memref<1x1x256xf32, #tpu.memory_space<vmem>>, vector<1x1x256xf32>,
    %c0_i32_9 = arith.constant 0 : i32
    %9 = arith.cmpi eq, %arg2, %c0_i32_9 : i32
    %10 = arith.extui %9 : i1 to i32
    %c0_i32_10 = arith.constant 0 : i32
    %11 = arith.cmpi ne, %10, %c0_i32_10 : i32
    scf.if %11 {
      %c0_11 = arith.constant 0 : index
      %c0_12 = arith.constant 0 : index
      %c0_13 = arith.constant 0 : index
      %12 = vector.load %arg5[%c0_11, %c0_12, %c0_13] : memref<1x1x256xf32, #tpu.memory_space<vmem>>, vector<1x1x256xf32>
      %cst_14 = arith.constant 2.000000e+00 : f32
      %13 = vector.broadcast %cst_14 : f32 to vector<1x1x256xf32>
      %14 = arith.mulf %12, %13 : vector<1x1x256xf32>
      %c0_15 = arith.constant 0 : index
      %c0_16 = arith.constant 0 : index
      %c0_17 = arith.constant 0 : index
      %15 = vector.load %arg4[%c0_15, %c0_16, %c0_17] : memref<1x1x256xf32, #tpu.memory_space<vmem>>, vector<1x1x256xf32>
      tpu.vector_store %arg4[%c0_15, %c0_16, %c0_17], %14 {strides = array<i32>} : memref<1x1x256xf32, #tpu.memory_space<vmem>>, vector<1x1x256xf32>,
    } else {
    }
    return
  }
  func.func @transform_0(%arg0: i32, %arg1: i32, %arg2: i32) -> (i32, i32, i32) {
    %c0_i32 = arith.constant 0 : i32
    return %arg0, %arg2, %arg1 : i32, i32, i32
  }
  func.func @transform_1(%arg0: i32, %arg1: i32, %arg2: i32) -> (i32, i32, i32) {
    %c0_i32 = arith.constant 0 : i32
    %c0_i32_0 = arith.constant 0 : i32
    return %arg0, %c0_i32, %arg1 : i32, i32, i32
  }
}

</mosaic_0001>

<bundles_post_ra>
// kernel: tpu_custom_call.1
= control target key start
LH: loop header
LB: loop body
LE: loop exit
PB: predicated region body
PF: predicated region fallthrough
CT: control target
= control target key end

     0   :  { %6 = vsyncpa [#allocation4], 0  ;;  %s722_s0 = inlined_call_operand.hbm [shape: f32[2,4,256], index: 0, kind: input, shape index: {}]   ;;  %s723_s1 = inlined_call_operand.hbm [shape: f32[2,1,256], index: 1, kind: output, shape index: {}]  }
   0x1   :  { %8 = vsyncpa [#allocation4 + $0x1], 0 }
   0x2   :  { %9 = vsyncpa [#allocation5], 0 }
   0x3   :  { %11 = vsyncpa [#allocation5 + $0x1], 0  ;;  %s539_s6 = smov 0   ;;  %s541_s7 = smov 0  }
   0x4   :  { %s543_s8 = smov 0   ;;  %s545_s9 = smov 0  }
   0x5   :  { %s547_s10 = smov 0   ;;  %s549_s11 = smov 0  }
   0x6 LB: > { %s329_s12 = sadd.s32 4294967295, %s523_s11   ;;  %s330_s13 = sadd.s32 4294967294, %s523_s11   ;;  %s523_s11 = sphi %s549_s11, %s17_s11   ;;  %s519_s10 = sphi %s547_s10, %s741_s10   ;;  %s515_s9 = sphi %s545_s9, %s740_s9   ;;  %s511_s8 = sphi %s543_s8, %s739_s8   ;;  %s507_s7 = sphi %s541_s7, %s738_s7   ;;  %s503_s6 = sphi %s539_s6, %s737_s6  }
   0x7   : > { %s36_s14 = sadd.s32 1, %s519_s10  ;;  %s47_s15 = sadd.s32 1, %s511_s8 }
   0x8   : > { %p38_p0 = scmp.ge.s32.totalorder %s36_s14, 2  ;;  %p54_p1 = scmp.ne.s32.totalorder %s511_s8, %s507_s7 }
   0x9   : > { %p55_p2 = scmp.eq.s32.totalorder %s523_s11, 0  ;;  %p60_p3 = scmp.ne.s32.totalorder %s507_s7, %s503_s6 }
   0xa   : > { %s743_s14 = smov (%p38_p0, %s36_s14), 0  ;;  %p61_p5 = scmp.eq.s32.totalorder %s329_s12, 0 }
   0xb   : > { %p580_p4 = por %p55_p2, %p54_p1  ;;  %s40_s17 = ssub.s32 %s519_s10, %s743_s14 }
   0xc   : > { %p86_p6 = scmp.eq.s32.totalorder %s329_s12, 1  ;;  %p45_p7 = scmp.eq.s32.totalorder %s40_s17, 0 }
   0xd   : > { %p586_p8 = por %p61_p5, %p60_p3  ;;  %p92_p10 = scmp.eq.s32.totalorder %s330_s13, 1 }
   0xe   : > { %p590_p9 = por %p86_p6, %p54_p1  ;;  %p358_p13 = scmp.lt.s32.totalorder %s523_s11, 2 }
   0xf   : > { %s595_s20 = scalar_select %p45_p7, %s511_s8, %s47_s15  }
  0x10   : > { %s727_s19 = scalar_select %p590_p9, 1, 0 }
  0x11   : > { %p597_p11 = por %p92_p10, %p60_p3  ;;  %s112_s22 = sand.u32 1, %s511_s8  }
  0x12   : > { %s333_s23 = sshll.u32 %s112_s22, 3  ;;  %s344_s24 = sshll.u32 %s519_s10, 7 }
  0x13   : > { %s728_s21 = scalar_select %p597_p11, 1, 0 }
  0x14   : > { %s608_s27 = scalar_lea.hbm %s722_s0, %s344_s24  ;;  %s116_s28 = scalar_lea.vmem [#allocation3], %s333_s23 }
  0x15   : > { %s128_s29 = sshll.u32 %s116_s28, 4  ;;  %p614_p0 = pnand %p358_p13, %p580_p4  ;;  %s610_s29 = int_to_ptr.vmem [resolvable:$true] %s128_s29 }
  0x16   : > { %s113_s2 = scalar_lea.sflag [#allocation4], %s112_s22  ;;  %s411_s3 = scalar_lea.hbm %s608_s27, 128 }
  0x17   : > { %p412_p3 = scmp.ne.s32.totalorder %s608_s27, %s411_s3  ;;  %p413_p5 = pneg %p614_p0 }
  0x18   : > { %s416_s12 = scalar_lea.hbm %s722_s0, 256  ;;  %p417_p4 = scmp.lt.u32.totalorder %s608_s27, %s722_s0 }
  0x19   : > { %p414_p6 = pnand %p413_p5, %p412_p3  ;;  %p418_p10 = scmp.lt.u32.totalorder %s416_s12, %s411_s3 }
  0x1a   : > { %p420_p12 = scmp.lt.u32.totalorder %s411_s3, %s608_s27 }
  0x1b   : > { %p415_p7 = pneg %p414_p6  ;;  %p419_p13 = por %p418_p10, %p417_p4 }
  0x1d   : > { %p421_p1 = por %p420_p12, %p419_p13 }
  0x1f   : > { %p422_p2 = pnand %p421_p1, %p415_p7 }
  0x21   : > { %425 = shalt.err (!%p422_p2)
}
  0x22   : > { %s426_s16 = scalar_lea.vmem %s610_s29, 128  ;;  %s525_s17 = smov [#allocation3]  }
  0x23   : > { %p427_p3 = scmp.ne.s32.totalorder %s610_s29, %s426_s16  ;;  %s431_s22 = sshll.u32 %s525_s17, 4  ;;  %s432_s22 = int_to_ptr.vmem [resolvable:$false] %s431_s22 }
  0x24   : > { %s433_s23 = scalar_lea.vmem %s432_s22, 256  ;;  %p434_p9 = scmp.lt.s32.totalorder %s610_s29, %s432_s22 }
  0x25   : > { %p429_p6 = pnand %p427_p3, %p413_p5  ;;  %p435_p4 = scmp.lt.s32.totalorder %s433_s23, %s426_s16 }
  0x27   : > { %p430_p11 = pneg %p429_p6  ;;  %p436_p10 = por %p435_p4, %p434_p9 }
  0x29   : > { %p437_p12 = pnand %p436_p10, %p430_p11 }
  0x2b   : > { %440 = shalt.err (!%p437_p12)
}
  0x2c   : > { %353 = dma.hbm_to_vmem [thread:$0]  (!%p614_p0), %s608_s27, 128, %s610_s29, %s113_s2  }
  0x2d   : > { %p730_p1 = scmp.lt.s32.totalorder %s523_s11, 3  ;;  %p731_p2 = scmp.ge.s32.totalorder %s523_s11, 1 }
  0x2f   : > { %p134_p5 = pnand %p731_p2, %p730_p1 }
  0x30   : > { %s650_s24 = sand.u32 (!%p134_p5), 1, %s507_s7  }
  0x31   : > { %137 = sbr.rel (%p134_p5) target bundleno = 105 (0x69), region = 24  ;;  %s337_s25 = sshll.u32 (!%p134_p5), %s650_s24, 3 }
  0x32   : > { %s140_s26 = scalar_lea.sflag (!%p134_p5), [#allocation4], %s650_s24  ;;  %s143_s28 = scalar_lea.vmem (!%p134_p5), [#allocation3], %s337_s25 }
  0x38   : > { %494 = dma.done.wait (%p586_p8), %s140_s26, 128  }
  0x39   : > { %496 = vsyncadd (%p586_p8), %s140_s26, 4294967168  ;;  %v168_v0 = vlaneseq  ;;  %v526_v2 = vmov 0.0   ;;  %vm178_vm1 = vcmask 1043456   ;;  %v173_v3 = vld [vmem:[%s143_s28] sm:$0xff]  ;;  %v527_v12 = vmov 1966171168  }
  0x3a   : > { %v176_v4 = vcombine.high %v173_v3, %v173_v3  ;;  %v179_v5 = vsel %vm178_vm1, %v173_v3, 0.0  ;;  %v197_v13 = vunpack.c.l.s4 %v527_v12  ;;  %s338_s18 = sshll.u32 %s650_s24, 1  ;;  %s345_s30 = sshll.u32 %s515_s9, 5 }
  0x3b   : > { %vm658_vm0 = vcmp.lt.s32.totalorder %v168_v0, 256  ;;  %v180_v6 = vrot.slane %v179_v5, 4  ;;  %v200_v19 = vshrl.u32 %v168_v0, 7  ;;  %s161_s27 = scalar_lea.vmem [#allocation6], %s338_s18  ;;  %s673_s4 = scalar_lea.hbm %s723_s1, %s345_s30 }
  0x3c   : > { %172 = vst.msk [vmem:[#allocation2] sm:$0x3] %vm658_vm0, %v526_v2  ;;  %v186_v7 = vsel %vm178_vm1, %v176_v4, 0.0  ;;  %v198_v18 = vunpack.c.0.s8 %v197_v13  ;;  %s240_s29 = sshll.u32 %s161_s27, 4  ;;  %s224_s5 = scalar_lea.sflag [#allocation5], %s650_s24  ;;  %s668_s29 = int_to_ptr.vmem [resolvable:$true] %s240_s29 }
  0x3d   : > { %v181_v8 = vadd.f32 %v180_v6, %v179_v5  ;;  %v187_v9 = vrot.slane %v186_v7, 4  ;;  %s441_s12 = scalar_lea.vmem %s668_s29, 32  ;;  %p734_p9 = scmp.ne.s32.totalorder %s727_s19, 0 }
  0x3e   : > { %v201_v23 = vsub.s32 %v198_v18, %v200_v19  ;;  %p442_p8 = scmp.ne.s32.totalorder %s668_s29, %s441_s12  ;;  %s528_s9 = smov [#allocation6]  }
  0x3f   : > { %v182_v10 = vrot.slane %v181_v8, 2  ;;  %v188_v11 = vadd.f32 %v187_v9, %v186_v7  ;;  %s445_s13 = sshll.u32 %s528_s9, 4  ;;  %s446_s13 = int_to_ptr.vmem [resolvable:$false] %s445_s13 }
  0x40   : > { %p443_p11 = pnand %p442_p8, %p734_p9  ;;  %s447_s15 = scalar_lea.vmem %s446_s13, 64 }
  0x41   : > { %v183_v14 = vadd.f32 %v182_v10, %v181_v8  ;;  %v189_v15 = vrot.slane %v188_v11, 2  ;;  %p448_p7 = scmp.lt.s32.totalorder %s668_s29, %s446_s13  ;;  %p449_p13 = scmp.lt.s32.totalorder %s447_s15, %s441_s12 }
  0x42   : > { %p444_p0 = pneg %p443_p11 }
  0x43   : > { %v184_v16 = vrot.slane %v183_v14, 1  ;;  %v190_v17 = vadd.f32 %v189_v15, %v188_v11  ;;  %v174_v26 = vld [vmem:[#allocation2] sm:$0x3]  ;;  %p450_p3 = por %p449_p13, %p448_p7 }
  0x45   : > { %v185_v20 = vadd.f32 %v184_v16, %v183_v14  ;;  %v191_v21 = vrot.slane %v190_v17, 1  ;;  %p451_p6 = pnand %p450_p3, %p444_p0 }
  0x47   : > { %v192_v22 = vadd.f32 %v191_v21, %v190_v17 }
  0x49   : > { %v195_v24 = vcombine.low %v185_v20, %v192_v22 }
  0x4b   : > { %v202_v25 = vrot.slane %v195_v24, %v201_v23 }
  0x4d   : > { %v209_v27 = vrot.slane %v202_v25, %v201_v23 }
  0x4f   : > { %v211_v28 = vadd.f32 %v209_v27, %v174_v26 }
  0x51   : > { %216 = vst.msk [vmem:[#allocation2] sm:$0x3] %vm658_vm0, %v211_v28 }
  0x58   : > { %v220_v29 = vld [vmem:[#allocation2] sm:$0x3] }
  0x59   : > { %v221_v30 = vmul.f32 2.0, %v220_v29 }
  0x5b   : > { %222 = vst.msk [vmem:[%s161_s27] sm:$0x3] %vm658_vm0, %v221_v30 }
  0x5c   : > { %454 = shalt.err (!%p451_p6)
}
  0x5d   : > { %s455_s16 = scalar_lea.hbm %s673_s4, 32  ;;  %s459_s23 = scalar_lea.hbm %s723_s1, 64 }
  0x5e   : > { %p456_p4 = scmp.ne.s32.totalorder %s673_s4, %s455_s16  ;;  %p460_p1 = scmp.lt.u32.totalorder %s673_s4, %s723_s1 }
  0x5f   : > { %p461_p2 = scmp.lt.u32.totalorder %s459_s23, %s455_s16  ;;  %p463_p8 = scmp.lt.u32.totalorder %s455_s16, %s673_s4 }
  0x60   : > { %p457_p10 = pnand %p456_p4, %p734_p9 }
  0x61   : > { %p462_p5 = por %p461_p2, %p460_p1 }
  0x62   : > { %p458_p12 = pneg %p457_p10 }
  0x63   : > { %p464_p11 = por %p463_p8, %p462_p5 }
  0x65   : > { %p465_p0 = pnand %p464_p11, %p458_p12 }
  0x67   : > { %468 = shalt.err (!%p465_p0)
}
  0x68   : > { %348 = dma.vmem_to_hbm [thread:$0]  (%p734_p9), %s668_s29, 32, %s673_s4, %s224_s5  }
  0x69 PF: > { %s252_s26 = sand.u32 1, %s503_s6   ;;  %p735_p7 = scmp.ne.s32.totalorder %s728_s21, 0 }
  0x6a   : > { %p736_p13 = scmp.ge.s32.totalorder %s523_s11, 2  ;;  %s253_s28 = scalar_lea.sflag [#allocation5], %s252_s26 }
  0x6c   : > { %p355_p3 = pnand %p736_p13, %p735_p7 }
  0x6e   : > { %498 = dma.done.wait (!%p355_p3), %s253_s28, 32  }
  0x6f   : > { %500 = vsyncadd (!%p355_p3), %s253_s28, 4294967264  ;;  %s17_s11 = sadd.s32 1, %s523_s11   ;;  %s737_s6 = smov %s507_s7 }
  0x70   : > { %p14_p6 = scmp.ge.s32.totalorder %s17_s11, 4   ;;  %s738_s7 = smov %s511_s8 }
  0x71   : > { %s739_s8 = smov %s595_s20  ;;  %s740_s9 = smov %s519_s10 }
  0x72   : > { %s741_s10 = smov %s743_s14  ;;  %16 = sbr.rel (!%p14_p6) target bundleno = 6 (0x6), region = 77 }
  0x79   :  { %258 = vsyncpa [#allocation4], 1 }
  0x7a   :  { %260 = vsyncpa [#allocation4 + $0x1], 1 }
  0x7b   :  { %261 = vsyncpa [#allocation5], 1 }
  0x7c   :  { %263 = vsyncpa [#allocation5 + $0x1], 1 }

</bundles_post_ra>
